<compile_context>
chip_gen: v7x
topology: tpu7x:2x2x1
jax: 0.10.0
libtpu: 0.0.40
codegen_flags: <defaults>
</compile_context>

<pallas_src>
import jax
import jax.numpy as jnp
from jax import lax
from jax.experimental import pallas as pl
from jax.experimental.pallas import tpu as pltpu

_MAX_BLOCK_ELEMS = 2048 * 512   # 1M elems -> 4 MiB f32 per input per pipeline buffer


def _round_up(x, m):
    return ((x + m - 1) // m) * m


def _make_mse_partial_kernel(rows_per_block, lane, num_blocks, tail_rows):
    """Kernel computing (8, lane) partial sums of squared differences per block."""
    need_mask = tail_rows != rows_per_block
    groups = rows_per_block // 8

    def kernel(pred_ref, tgt_ref, out_ref):
        # Cast each operand to f32 BEFORE subtracting (bf16-safe difference).
        d = pred_ref[...].astype(jnp.float32) - tgt_ref[...].astype(jnp.float32)
        if need_mask:
            # Last block may overhang the array: rows beyond `tail_rows` hold
            # undefined data -> zero them before squaring (cheap VPU select,
            # fully hidden under the DMA bound).
            row_idx = lax.broadcasted_iota(jnp.int32, (rows_per_block, lane), 0)
            limit = jnp.where(pl.program_id(0) == num_blocks - 1,
                              tail_rows, rows_per_block)
            d = jnp.where(row_idx < limit, d, 0.0)
        dd = d * d
        # Fold rows down to 8 sublanes only (keeps the store (8,128)-aligned and
        # avoids a cross-sublane XLU reduce); final reduce happens in JAX.
        out_ref[...] = jnp.sum(dd.reshape(groups, 8, lane), axis=0)

    return kernel


def mse_loss_pallas(pred, target):
    """Sum over the leading dim of per-item mean squared error (fp32 scalar)."""
    assert pred.shape == target.shape, (pred.shape, target.shape)
    n_items = pred.shape[0]
    per_item = 1
    for s in pred.shape[1:]:
        per_item *= s
    total = n_items * per_item

    # --- lane-dense layout, copy-free when total divides 8*lane -------------
    lane = None
    for cand in (512, 256, 128):
        if total % (8 * cand) == 0:
            lane = cand
            break

    pf = pred.reshape(-1)
    tf = target.reshape(-1)
    if lane is None:
        # TODO(synk): totals not divisible by 1024 take a small zero-pad copy;
        # a fully copy-free path would need a manual-DMA (pl.ANY) kernel.
        lane = 128
        padded = _round_up(total, 8 * lane)
        pad = padded - total
        pf = jnp.concatenate([pf, jnp.zeros((pad,), pf.dtype)])
        tf = jnp.concatenate([tf, jnp.zeros((pad,), tf.dtype)])
        total_elems = padded
    else:
        total_elems = total
    rows = total_elems // lane                 # multiple of 8 by construction

    # --- block-row choice: amortize ~0.35us/step, stay inside VMEM, and keep
    #     >= 2 balanced blocks so v7x can shard across both TensorCores -------
    max_rows = max(8, (_MAX_BLOCK_ELEMS // lane) // 8 * 8)
    min_blocks = 2 if rows >= 16 else 1
    num_blocks = max(min_blocks, pl.cdiv(rows, max_rows))
    rows_per_block = min(max_rows, _round_up(pl.cdiv(rows, num_blocks), 8))
    num_blocks = pl.cdiv(rows, rows_per_block)
    tail_rows = rows - (num_blocks - 1) * rows_per_block

    p2 = pf.reshape(rows, lane)
    t2 = tf.reshape(rows, lane)

    kernel = _make_mse_partial_kernel(rows_per_block, lane, num_blocks, tail_rows)

    bytes_in = 2 * total_elems * pred.dtype.itemsize
    bytes_out = num_blocks * 8 * lane * 4

    partials = pl.pallas_call(
        kernel,
        out_shape=jax.ShapeDtypeStruct((num_blocks * 8, lane), jnp.float32),
        grid_spec=pltpu.PrefetchScalarGridSpec(
            num_scalar_prefetch=0,
            grid=(num_blocks,),
            in_specs=[
                pl.BlockSpec((rows_per_block, lane), lambda i: (i, 0)),
                pl.BlockSpec((rows_per_block, lane), lambda i: (i, 0)),
            ],
            out_specs=pl.BlockSpec((8, lane), lambda i: (i, 0)),
        ),
        compiler_params=pltpu.CompilerParams(
            # Each block writes its own output rows -> safe to shard across TCs
            # (no-op on single-TC v5e/v6e).
            dimension_semantics=("parallel",),
            # Covers 2 inputs x 2 pipeline buffers x 4 MiB worst case; also
            # lifts v5e's 16 MiB default scoped limit, fits v7x's 64 MiB VMEM.
            vmem_limit_bytes=32 * 1024 * 1024,
        ),
        cost_estimate=pl.CostEstimate(
            flops=3 * total_elems,
            bytes_accessed=bytes_in + bytes_out,
            transcendentals=0,
        ),
    )(p2, t2)

    # Tiny final reduce + the single 1/E scale (replaces per-item divides).
    return jnp.sum(partials) / jnp.float32(per_item)


def _ref_loss(pred, target):
    axes = tuple(range(1, pred.ndim))
    p = pred.astype(jnp.float32)
    t = target.astype(jnp.float32)
    return jnp.sum(jnp.mean((p - t) ** 2, axis=axes))


if __name__ == "__main__":
    key = jax.random.PRNGKey(0)
    k1, k2, k3, k4, k5, k6 = jax.random.split(key, 6)

    # Case 1: small NCHW feature maps (single block, lane=256 path).
    pred1 = jax.random.normal(k1, (2, 4, 16, 16), dtype=jnp.float32)
    tgt1 = jax.random.normal(k2, (2, 4, 16, 16), dtype=jnp.float32)
    out1 = jax.block_until_ready(mse_loss_pallas(pred1, tgt1))
    ref1 = _ref_loss(pred1, tgt1)
    assert jnp.allclose(out1, ref1, rtol=1e-4, atol=1e-4), (out1, ref1)

    # Case 2: larger shape -> two balanced blocks on the "parallel" grid axis.
    pred2 = jax.random.normal(k3, (2, 16, 64, 160), dtype=jnp.float32)
    tgt2 = jax.random.normal(k4, (2, 16, 64, 160), dtype=jnp.float32)
    out2 = jax.block_until_ready(mse_loss_pallas(pred2, tgt2))
    ref2 = _ref_loss(pred2, tgt2)
    assert jnp.allclose(out2, ref2, rtol=1e-4, atol=1e-4), (out2, ref2)

    # Case 3: rows not divisible by the block -> exercises the in-kernel tail mask.
    pred3 = jax.random.normal(k5, (3, 4, 16, 16), dtype=jnp.float32)
    tgt3 = jax.random.normal(k6, (3, 4, 16, 16), dtype=jnp.float32)
    out3 = jax.block_until_ready(mse_loss_pallas(pred3, tgt3))
    ref3 = _ref_loss(pred3, tgt3)
    assert jnp.allclose(out3, ref3, rtol=1e-4, atol=1e-4), (out3, ref3)

    # Case 4: bf16 inputs (operands cast to f32 before the in-kernel subtract).
    pred4 = pred1.astype(jnp.bfloat16)
    tgt4 = tgt1.astype(jnp.bfloat16)
    out4 = jax.block_until_ready(mse_loss_pallas(pred4, tgt4))
    ref4 = _ref_loss(pred4, tgt4)
    assert jnp.allclose(out4, ref4, rtol=1e-3, atol=1e-3), (out4, ref4)

    print("KERNEL_OK")
</pallas_src>

<mosaic_0001>
module attributes {stable_mosaic.version = 11 : i64} {
  func.func @kernel(%arg0: i32, %arg1: memref<8x256xf32, #tpu.memory_space<vmem>>, %arg2: memref<8x256xf32, #tpu.memory_space<vmem>>, %arg3: memref<8x256xf32, #tpu.memory_space<vmem>>) attributes {dimension_semantics = [#tpu.dimension_semantics<parallel>], iteration_bounds = array<i64: 1>, scalar_prefetch = 0 : i64, scratch_operands = 0 : i64, tpu.core_type = #tpu.core_type<tc>, window_params = [{transform_indices = @transform_0, window_bounds = array<i64: 8, 256>}, {transform_indices = @transform_1, window_bounds = array<i64: 8, 256>}, {transform_indices = @transform_2, window_bounds = array<i64: 8, 256>}]} {
    %c0 = arith.constant 0 : index
    %c0_0 = arith.constant 0 : index
    %0 = vector.load %arg1[%c0, %c0_0] : memref<8x256xf32, #tpu.memory_space<vmem>>, vector<8x256xf32>
    %c0_1 = arith.constant 0 : index
    %c0_2 = arith.constant 0 : index
    %1 = vector.load %arg2[%c0_1, %c0_2] : memref<8x256xf32, #tpu.memory_space<vmem>>, vector<8x256xf32>
    %2 = arith.subf %0, %1 : vector<8x256xf32>
    %3 = arith.mulf %2, %2 : vector<8x256xf32>
    %4 = vector.shape_cast %3 : vector<8x256xf32> to vector<1x8x256xf32>
    %cst = arith.constant dense<0.000000e+00> : vector<8x256xf32>
    %5 = vector.multi_reduction <add>, %4, %cst [0] : vector<1x8x256xf32> to vector<8x256xf32>
    %c0_3 = arith.constant 0 : index
    %c0_4 = arith.constant 0 : index
    %6 = vector.load %arg3[%c0_3, %c0_4] : memref<8x256xf32, #tpu.memory_space<vmem>>, vector<8x256xf32>
    tpu.vector_store %arg3[%c0_3, %c0_4], %5 {strides = array<i32>} : memref<8x256xf32, #tpu.memory_space<vmem>>, vector<8x256xf32>,
    return
  }
  func.func @transform_0(%arg0: i32) -> (i32, i32) {
    %c0_i32 = arith.constant 0 : i32
    %c0_i32_0 = arith.constant 0 : i32
    return %arg0, %c0_i32 : i32, i32
  }
  func.func @transform_1(%arg0: i32) -> (i32, i32) {
    %c0_i32 = arith.constant 0 : i32
    %c0_i32_0 = arith.constant 0 : i32
    return %arg0, %c0_i32 : i32, i32
  }
  func.func @transform_2(%arg0: i32) -> (i32, i32) {
    %c0_i32 = arith.constant 0 : i32
    %c0_i32_0 = arith.constant 0 : i32
    return %arg0, %c0_i32 : i32, i32
  }
}

</mosaic_0001>

<bundles_post_ra>
// kernel: tpu_custom_call.1
= control target key start
LH: loop header
LB: loop body
LE: loop exit
PB: predicated region body
PF: predicated region fallthrough
CT: control target
= control target key end

     0   :  { %7 = vsyncpa [#allocation3], 0  ;;  %s193_s0 = inlined_call_operand.hbm [shape: f32[8,256], index: 0, kind: input, shape index: {}]   ;;  %s194_s1 = inlined_call_operand.hbm [shape: f32[8,256], index: 1, kind: input, shape index: {}]   ;;  %s195_s2 = inlined_call_operand.hbm [shape: f32[8,256], index: 2, kind: output, shape index: {}]  }
   0x1   :  { %8 = vsyncpa [#allocation6], 0 }
   0x2   :  { %9 = vsyncpa [#allocation4], 0  ;;  %s139_s9 = smov [#allocation2]   ;;  %s140_s11 = smov [#allocation5]  }
   0x3   :  { %s16_s10 = sshll.u32 %s139_s9, 4  ;;  %s26_s12 = sshll.u32 %s140_s11, 4  ;;  %s17_s10 = int_to_ptr.vmem [resolvable:$true] %s16_s10  ;;  %s27_s12 = int_to_ptr.vmem [resolvable:$true] %s26_s12 }
   0x4   :  { %s67_s15 = scalar_lea.hbm %s193_s0, 256 }
   0x5   :  { %p68_p0 = scmp.ne.s32.totalorder %s193_s0, %s67_s15  ;;  %p71_p1 = scmp.lt.u32.totalorder %s67_s15, %s193_s0 }
   0x7   :  { %p73_p2 = pnand %p71_p1, %p68_p0 }
   0x9   :  { %76 = shalt.err (!%p73_p2)
}
   0xa   :  { %s77_s20 = scalar_lea.vmem %s17_s10, 256  ;;  %p82_p4 = scmp.lt.s32.totalorder %s17_s10, %s17_s10 }
   0xb   :  { %p78_p3 = scmp.ne.s32.totalorder %s17_s10, %s77_s20  ;;  %p83_p5 = scmp.lt.s32.totalorder %s77_s20, %s77_s20 }
   0xd   :  { %p84_p6 = por %p83_p5, %p82_p4 }
   0xf   :  { %p85_p7 = pnand %p84_p6, %p78_p3 }
  0x11   :  { %88 = shalt.err (!%p85_p7)
}
  0x12   :  { %19 = dma.hbm_to_vmem [thread:$0]  %s193_s0, 256, %s17_s10, [#allocation3]  }
  0x13   :  { %s89_s25 = scalar_lea.hbm %s194_s1, 256 }
  0x14   :  { %p90_p8 = scmp.ne.s32.totalorder %s194_s1, %s89_s25  ;;  %p93_p9 = scmp.lt.u32.totalorder %s89_s25, %s194_s1 }
  0x16   :  { %p95_p10 = pnand %p93_p9, %p90_p8 }
  0x18   :  { %98 = shalt.err (!%p95_p10)
}
  0x19   :  { %s99_s30 = scalar_lea.vmem %s27_s12, 256  ;;  %p104_p12 = scmp.lt.s32.totalorder %s27_s12, %s27_s12 }
  0x1a   :  { %p100_p11 = scmp.ne.s32.totalorder %s27_s12, %s99_s30  ;;  %p105_p13 = scmp.lt.s32.totalorder %s99_s30, %s99_s30 }
  0x1c   :  { %p106_p0 = por %p105_p13, %p104_p12 }
  0x1e   :  { %p107_p1 = pnand %p106_p0, %p100_p11 }
  0x20   :  { %110 = shalt.err (!%p107_p1)
}
  0x21   :  { %29 = dma.hbm_to_vmem [thread:$0]  %s194_s1, 256, %s27_s12, [#allocation6]  }
  0x22   :  { %133 = dma.done.wait [#allocation3], 256  }
  0x23   :  { %134 = vsyncadd [#allocation3], 4294967040 }
  0x24   :  { %135 = dma.done.wait [#allocation6], 256  }
  0x25   :  { %136 = vsyncadd [#allocation6], 4294967040  ;;  %v36_v0 = vld [vmem:[#allocation2] sm:$0xff]  ;;  %v38_v1 = vld [vmem:[#allocation5] sm:$0xff]  ;;  %s141_s4 = smov [#allocation7]  }
  0x26   :  { %v37_v2 = vld [vmem:[#allocation2 + $0x8] sm:$0xff]  ;;  %v40_v3 = vsub.f32 %v36_v0, %v38_v1  ;;  %v39_v4 = vld [vmem:[#allocation5 + $0x8] sm:$0xff]  ;;  %s54_s5 = sshll.u32 %s141_s4, 4  ;;  %s55_s5 = int_to_ptr.vmem [resolvable:$true] %s54_s5 }
  0x27   :  { %v41_v5 = vsub.f32 %v37_v2, %v39_v4  ;;  %s111_s6 = scalar_lea.vmem %s55_s5, 256  ;;  %p116_p3 = scmp.lt.s32.totalorder %s55_s5, %s55_s5 }
  0x28   :  { %v42_v6 = vmul.f32 %v40_v3, %v40_v3  ;;  %p112_p2 = scmp.ne.s32.totalorder %s55_s5, %s111_s6  ;;  %p117_p4 = scmp.lt.s32.totalorder %s111_s6, %s111_s6 }
  0x29   :  { %v43_v7 = vmul.f32 %v41_v5, %v41_v5 }
  0x2a   :  { %46 = vst [vmem:[#allocation7] sm:$0xff] %v42_v6  ;;  %p118_p5 = por %p117_p4, %p116_p3 }
  0x2b   :  { %47 = vst [vmem:[#allocation7 + $0x8] sm:$0xff] %v43_v7 }
  0x2c   :  { %p119_p6 = pnand %p118_p5, %p112_p2 }
  0x2e   :  { %122 = shalt.err (!%p119_p6)
}
  0x2f   :  { %s123_s8 = scalar_lea.hbm %s195_s2, 256 }
  0x30   :  { %p124_p7 = scmp.ne.s32.totalorder %s195_s2, %s123_s8  ;;  %p127_p8 = scmp.lt.u32.totalorder %s123_s8, %s195_s2 }
  0x32   :  { %p129_p9 = pnand %p127_p8, %p124_p7 }
  0x34   :  { %132 = shalt.err (!%p129_p9)
}
  0x35   :  { %57 = dma.vmem_to_hbm [thread:$0]  %s55_s5, 256, %s195_s2, [#allocation4]  }
  0x36   :  { %137 = dma.done.wait [#allocation4], 256  }
  0x37   :  { %138 = vsyncadd [#allocation4], 4294967040 }
  0x38   :  { %61 = vsyncpa [#allocation3], 1 }
  0x39   :  { %62 = vsyncpa [#allocation6], 1 }
  0x3a   :  { %63 = vsyncpa [#allocation4], 1 }

</bundles_post_ra>
